<compile_context>
chip_gen: v7x
topology: tpu7x:2x2x1
jax: 0.10.0
libtpu: 0.0.40
codegen_flags: <defaults>
</compile_context>

<pallas_src>
import jax
import jax.numpy as jnp
from jax.experimental import pallas as pl
from jax.experimental.pallas import tpu as pltpu

# ----------------------------- configuration -------------------------------
OBS_SIZE = 24
ASE_LATENT_SIZE = 8
UNITS = (64, 32)
IN0 = OBS_SIZE + ASE_LATENT_SIZE          # width of cat([obs, latent])
BATCH = 2                                 # small demo batch
LANE = 128                                # TPU lane width

_ACT = lambda x: jnp.maximum(x, 0.0)      # `activation` in the builder == ReLU


def _round_up(x, m):
    return (x + m - 1) // m * m


# ------------------------------- kernel -------------------------------------
def _amp_mlp_kernel(xT_ref, w0t_ref, b0_ref, w1t_ref, b1_ref, outT_ref):
    """One batch tile; the batch lives on the lane/N axis.

    xT_ref  : (IN0, TB)   transposed activations, cat([obs, latent]) fused on host
    w0t_ref : (U0, IN0)   layer-0 weight in (out, in) layout
    b0_ref  : (U0, 1)     f32 bias column (broadcast over lanes)
    w1t_ref : (U1, U0)
    b1_ref  : (U1, 1)
    outT_ref: (U1, TB)
    """
    f32 = jnp.float32
    x = xT_ref[...]                                             # storage dtype (f32 / bf16)

    # ---- layer 0: single K=IN0 dot, batch on N (lane-dense, few MXU pushes) ----
    h = jnp.dot(w0t_ref[...], x, preferred_element_type=f32)    # (U0, TB) f32 accumulate
    h = _ACT(h + b0_ref[...].astype(f32))                       # bias/ReLU in f32 on the VPU

    # ---- layer 1 ----
    y = jnp.dot(w1t_ref[...], h.astype(w1t_ref.dtype),
                preferred_element_type=f32)                     # (U1, TB)
    y = _ACT(y + b1_ref[...].astype(f32))

    outT_ref[...] = y.astype(outT_ref.dtype)                    # TB lanes -> unmasked stores


# ------------------------------- wrapper -------------------------------------
def _choose_batch_tile(batch, block_batch):
    """Batch tile (multiple of 128 lanes) and padded batch; prefers >=2 grid steps."""
    tb = _round_up(max(min(block_batch, batch), 1), LANE)
    bp_min = _round_up(batch, LANE)
    if bp_min >= 2 * LANE:
        # cap the tile so multi-TensorCore parts (v7x) get at least 2 parallel grid steps
        tb = min(tb, _round_up(bp_min // 2, LANE))
    tb = max(tb, LANE)
    bp = _round_up(batch, tb)
    return tb, bp


def _vmem_limit_bytes(tb, itemsize):
    """Conservative VMEM budget: double-buffered activation + param tiles, padded shapes."""
    def tile_bytes(rows, cols, isz):
        return _round_up(rows, 8) * _round_up(cols, LANE) * isz

    act = tile_bytes(IN0, tb, itemsize) + tile_bytes(UNITS[-1], tb, itemsize)
    par = (tile_bytes(UNITS[0], IN0, itemsize) + tile_bytes(UNITS[0], 1, 4)
           + tile_bytes(UNITS[1], UNITS[0], itemsize) + tile_bytes(UNITS[1], 1, 4))
    need = 2 * (act + par)                      # BlockSpec double-buffering
    need += tile_bytes(UNITS[0], tb, 4)         # f32 intermediate h
    need += 2 << 20                             # headroom
    return need if need > (16 << 20) else None  # only override scoped default when required


def amp_mlp_net(obs, latent, params, skip_style=False, *,
                block_batch=2048, dtype=jnp.float32):
    """Full AMPMLPNet.forward in one pallas_call, batch tiled on the lane axis."""
    del skip_style  # accepted but unused by AMPMLPNet.forward (API parity with torch)
    w0, b0, w1, b1 = params                    # w* stored (in, out); b* shape (1, out)

    batch = obs.shape[0]
    tb, bp = _choose_batch_tile(batch, block_batch)
    grid = (bp // tb,)

    # Host-side fusion of cat([obs, latent]) + batch-on-lanes transpose -> (IN0, B).
    # One extra XLA pass over a tiny (B, 32) slab; net win because the kernel was
    # MXU-push-bound, not memory-bound.
    xT = jnp.concatenate([obs.T, latent.T], axis=0).astype(dtype)
    if bp != batch:
        xT = jnp.pad(xT, ((0, 0), (0, bp - batch)))            # zero-padded lanes, sliced off

    w0t = jnp.asarray(w0).T.astype(dtype)                       # (U0, IN0)
    w1t = jnp.asarray(w1).T.astype(dtype)                       # (U1, U0)
    b0c = jnp.asarray(b0, jnp.float32).reshape(UNITS[0], 1)     # (U0, 1), f32
    b1c = jnp.asarray(b1, jnp.float32).reshape(UNITS[1], 1)     # (U1, 1), f32

    itemsize = jnp.dtype(dtype).itemsize
    flops = 2 * bp * (IN0 * UNITS[0] + UNITS[0] * UNITS[1])     # fused layer-0 (one dot)
    bytes_accessed = (itemsize * bp * (IN0 + UNITS[-1])
                      + itemsize * (w0t.size + w1t.size)
                      + 4 * (b0c.size + b1c.size))

    outT = pl.pallas_call(
        _amp_mlp_kernel,
        out_shape=jax.ShapeDtypeStruct((UNITS[-1], bp), dtype),
        grid_spec=pltpu.PrefetchScalarGridSpec(
            num_scalar_prefetch=0,
            grid=grid,
            in_specs=[
                pl.BlockSpec((IN0, tb), lambda i: (0, i)),        # lane-dense activations
                # constant block index -> params DMA'd once, stay VMEM-resident
                pl.BlockSpec((UNITS[0], IN0), lambda i: (0, 0)),
                pl.BlockSpec((UNITS[0], 1), lambda i: (0, 0)),
                pl.BlockSpec((UNITS[1], UNITS[0]), lambda i: (0, 0)),
                pl.BlockSpec((UNITS[1], 1), lambda i: (0, 0)),
            ],
            out_specs=pl.BlockSpec((UNITS[-1], tb), lambda i: (0, i)),
        ),
        compiler_params=pltpu.CompilerParams(
            dimension_semantics=("parallel",),                    # megacore / 2-TC sharding
            vmem_limit_bytes=_vmem_limit_bytes(tb, itemsize),
        ),
        cost_estimate=pl.CostEstimate(
            flops=int(flops), transcendentals=0, bytes_accessed=int(bytes_accessed)),
    )(xT, w0t, b0c, w1t, b1c)

    # Back to the torch layout (B, units[-1]); padded lanes dropped.
    return outT[:, :batch].T


# ------------------------- deterministic parameters --------------------------
def init_params(key, *, zero_bias=True):
    """Mirrors AMPMLPNet.init_params: weights ~ initializer (uniform here), biases zero.
    zero_bias=False only exercises the bias path."""
    keys = jax.random.split(key, 4)

    def unif(k, shape, lo=-0.1, hi=0.1):
        return jax.random.uniform(k, shape, jnp.float32, lo, hi)

    w0 = unif(keys[0], (IN0, UNITS[0]))          # stored (in, out)
    w1 = unif(keys[1], (UNITS[0], UNITS[1]))
    if zero_bias:
        b0 = jnp.zeros((1, UNITS[0]), jnp.float32)
        b1 = jnp.zeros((1, UNITS[1]), jnp.float32)
    else:
        b0 = unif(keys[2], (1, UNITS[0]))
        b1 = unif(keys[3], (1, UNITS[1]))
    return (w0, b0, w1, b1)


# ------------------------------ pure-JAX reference ---------------------------
def reference_forward(obs, latent, params):
    w0, b0, w1, b1 = params
    x = jnp.concatenate([obs, latent], axis=-1)
    x = _ACT(x @ w0 + b0)
    x = _ACT(x @ w1 + b1)
    return x


# ---------------------------------- main --------------------------------------
if __name__ == "__main__":
    key = jax.random.PRNGKey(0)
    keys = jax.random.split(key, 8)

    # --- spec-faithful small case: batch=2, zero biases (as torch init_params) ---
    obs = jax.random.normal(keys[0], (BATCH, OBS_SIZE), jnp.float32)
    latent = jax.random.normal(keys[1], (BATCH, ASE_LATENT_SIZE), jnp.float32)
    params = init_params(keys[2])

    out = jax.block_until_ready(amp_mlp_net(obs, latent, params, skip_style=False))
    ref = reference_forward(obs, latent, params)
    assert out.shape == (BATCH, UNITS[-1]), out.shape
    assert jnp.allclose(out, ref, atol=1e-5, rtol=1e-5), "mismatch vs reference (batch=2)"

    # --- multi-step grid: ragged batch, small tile, nonzero biases ---
    b2 = 300
    obs2 = jax.random.normal(keys[3], (b2, OBS_SIZE), jnp.float32)
    latent2 = jax.random.normal(keys[4], (b2, ASE_LATENT_SIZE), jnp.float32)
    params2 = init_params(keys[5], zero_bias=False)

    out2 = jax.block_until_ready(
        amp_mlp_net(obs2, latent2, params2, skip_style=True, block_batch=128))
    ref2 = reference_forward(obs2, latent2, params2)
    assert out2.shape == (b2, UNITS[-1]), out2.shape
    assert jnp.allclose(out2, ref2, atol=1e-5, rtol=1e-5), "mismatch vs reference (grid case)"

    # --- bf16 storage path (perf mode for v6e/v7x); f32 MXU accumulation ---
    b3 = 20
    obs3 = jax.random.normal(keys[6], (b3, OBS_SIZE), jnp.float32)
    latent3 = jax.random.normal(keys[7], (b3, ASE_LATENT_SIZE), jnp.float32)
    out3 = jax.block_until_ready(
        amp_mlp_net(obs3, latent3, params2, dtype=jnp.bfloat16))
    ref3 = reference_forward(obs3, latent3, params2)
    assert out3.shape == (b3, UNITS[-1]), out3.shape
    assert jnp.allclose(out3.astype(jnp.float32), ref3, atol=3e-2, rtol=3e-2), \
        "mismatch vs reference (bf16 storage)"

    print("KERNEL_OK")
</pallas_src>

<mosaic_0001>
module attributes {stable_mosaic.version = 11 : i64} {
  func.func @_amp_mlp_kernel(%arg0: i32, %arg1: memref<32x128xf32, #tpu.memory_space<vmem>>, %arg2: memref<64x32xf32, #tpu.memory_space<vmem>>, %arg3: memref<64x1xf32, #tpu.memory_space<vmem>>, %arg4: memref<32x64xf32, #tpu.memory_space<vmem>>, %arg5: memref<32x1xf32, #tpu.memory_space<vmem>>, %arg6: memref<32x128xf32, #tpu.memory_space<vmem>>) attributes {dimension_semantics = [#tpu.dimension_semantics<parallel>], iteration_bounds = array<i64: 1>, scalar_prefetch = 0 : i64, scratch_operands = 0 : i64, tpu.core_type = #tpu.core_type<tc>, window_params = [{transform_indices = @transform_0, window_bounds = array<i64: 32, 128>}, {pipeline_mode = #tpu.pipeline_mode<synchronous>, transform_indices = @transform_1, window_bounds = array<i64: 64, 32>}, {pipeline_mode = #tpu.pipeline_mode<synchronous>, transform_indices = @transform_2, window_bounds = array<i64: 64, 1>}, {pipeline_mode = #tpu.pipeline_mode<synchronous>, transform_indices = @transform_3, window_bounds = array<i64: 32, 64>}, {pipeline_mode = #tpu.pipeline_mode<synchronous>, transform_indices = @transform_4, window_bounds = array<i64: 32, 1>}, {transform_indices = @transform_5, window_bounds = array<i64: 32, 128>}]} {
    %c0 = arith.constant 0 : index
    %c0_0 = arith.constant 0 : index
    %0 = vector.load %arg1[%c0, %c0_0] : memref<32x128xf32, #tpu.memory_space<vmem>>, vector<32x128xf32>
    %c0_1 = arith.constant 0 : index
    %c0_2 = arith.constant 0 : index
    %1 = vector.load %arg2[%c0_1, %c0_2] : memref<64x32xf32, #tpu.memory_space<vmem>>, vector<64x32xf32>
    %cst = arith.constant dense<0.000000e+00> : vector<64x128xf32>
    %2 = tpu.matmul %1, %0, %cst {dimension_numbers = #tpu.dot_dimension_numbers<[1], [0], [0], [1], [0, 0, 1, 1], [], []>} : vector<64x32xf32>, vector<32x128xf32>, vector<64x128xf32> -> vector<64x128xf32>
    %c0_3 = arith.constant 0 : index
    %c0_4 = arith.constant 0 : index
    %3 = vector.load %arg3[%c0_3, %c0_4] : memref<64x1xf32, #tpu.memory_space<vmem>>, vector<64x1xf32>
    %4 = vector.broadcast %3 : vector<64x1xf32> to vector<64x128xf32>
    %5 = arith.addf %2, %4 : vector<64x128xf32>
    %cst_5 = arith.constant 0.000000e+00 : f32
    %6 = vector.broadcast %cst_5 : f32 to vector<64x128xf32>
    %7 = arith.maximumf %5, %6 : vector<64x128xf32>
    %c0_6 = arith.constant 0 : index
    %c0_7 = arith.constant 0 : index
    %8 = vector.load %arg4[%c0_6, %c0_7] : memref<32x64xf32, #tpu.memory_space<vmem>>, vector<32x64xf32>
    %cst_8 = arith.constant dense<0.000000e+00> : vector<32x128xf32>
    %9 = tpu.matmul %8, %7, %cst_8 {dimension_numbers = #tpu.dot_dimension_numbers<[1], [0], [0], [1], [0, 0, 1, 1], [], []>} : vector<32x64xf32>, vector<64x128xf32>, vector<32x128xf32> -> vector<32x128xf32>
    %c0_9 = arith.constant 0 : index
    %c0_10 = arith.constant 0 : index
    %10 = vector.load %arg5[%c0_9, %c0_10] : memref<32x1xf32, #tpu.memory_space<vmem>>, vector<32x1xf32>
    %11 = vector.broadcast %10 : vector<32x1xf32> to vector<32x128xf32>
    %12 = arith.addf %9, %11 : vector<32x128xf32>
    %cst_11 = arith.constant 0.000000e+00 : f32
    %13 = vector.broadcast %cst_11 : f32 to vector<32x128xf32>
    %14 = arith.maximumf %12, %13 : vector<32x128xf32>
    %c0_12 = arith.constant 0 : index
    %c0_13 = arith.constant 0 : index
    %15 = vector.load %arg6[%c0_12, %c0_13] : memref<32x128xf32, #tpu.memory_space<vmem>>, vector<32x128xf32>
    tpu.vector_store %arg6[%c0_12, %c0_13], %14 {strides = array<i32>} : memref<32x128xf32, #tpu.memory_space<vmem>>, vector<32x128xf32>,
    return
  }
  func.func @transform_0(%arg0: i32) -> (i32, i32) {
    %c0_i32 = arith.constant 0 : i32
    %c0_i32_0 = arith.constant 0 : i32
    return %c0_i32, %arg0 : i32, i32
  }
  func.func @transform_1(%arg0: i32) -> (i32, i32) {
    %c0_i32 = arith.constant 0 : i32
    %c0_i32_0 = arith.constant 0 : i32
    %c0_i32_1 = arith.constant 0 : i32
    return %c0_i32, %c0_i32_0 : i32, i32
  }
  func.func @transform_2(%arg0: i32) -> (i32, i32) {
    %c0_i32 = arith.constant 0 : i32
    %c0_i32_0 = arith.constant 0 : i32
    %c0_i32_1 = arith.constant 0 : i32
    return %c0_i32, %c0_i32_0 : i32, i32
  }
  func.func @transform_3(%arg0: i32) -> (i32, i32) {
    %c0_i32 = arith.constant 0 : i32
    %c0_i32_0 = arith.constant 0 : i32
    %c0_i32_1 = arith.constant 0 : i32
    return %c0_i32, %c0_i32_0 : i32, i32
  }
  func.func @transform_4(%arg0: i32) -> (i32, i32) {
    %c0_i32 = arith.constant 0 : i32
    %c0_i32_0 = arith.constant 0 : i32
    %c0_i32_1 = arith.constant 0 : i32
    return %c0_i32, %c0_i32_0 : i32, i32
  }
  func.func @transform_5(%arg0: i32) -> (i32, i32) {
    %c0_i32 = arith.constant 0 : i32
    %c0_i32_0 = arith.constant 0 : i32
    return %c0_i32, %arg0 : i32, i32
  }
}

</mosaic_0001>

<bundles_post_ra>
// kernel: tpu_custom_call.1
= control target key start
LH: loop header
LB: loop body
LE: loop exit
PB: predicated region body
PF: predicated region fallthrough
CT: control target
= control target key end

     0   :  { %vm81_vm0 = vcmask 261120   ;;  %v501_v6 = vmov 0   ;;  %s643_s0 = inlined_call_operand.vmem [shape: f32[32,128], index: 0, kind: input, shape index: {}]   ;;  %s644_s1 = inlined_call_operand.vmem [shape: f32[64,32], index: 1, kind: input, shape index: {}]   ;;  %s645_s2 = inlined_call_operand.vmem [shape: f32[64,1], index: 2, kind: input, shape index: {}]   ;;  %s646_s3 = inlined_call_operand.vmem [shape: f32[32,64], index: 3, kind: input, shape index: {}]   ;;  %s647_s4 = inlined_call_operand.vmem [shape: f32[32,1], index: 4, kind: input, shape index: {}]   ;;  %s648_s5 = inlined_call_operand.hbm [shape: f32[32,128], index: 5, kind: output, shape index: {}]  }
   0x1   :  { %v21_v0 = vld [vmem:[%s643_s0] sm:$0xff]  ;;  %v22_v1 = vld [vmem:[%s643_s0 + $0x8] sm:$0xff]  ;;  %v23_v2 = vld [vmem:[%s643_s0 + $0x10] sm:$0xff]  ;;  %475 = vset.pattern.permute.xlu0 %v501_v6  ;;  %476 = vset.pattern.permute.xlu1 %v501_v6 }
   0x2   :  { %v447_v3 = vpack.c.bf16 %v22_v1, %v21_v0  ;;  %v24_v4 = vld [vmem:[%s643_s0 + $0x18] sm:$0xff]  ;;  %v25_v5 = vld [vmem:[%s644_s1] sm:$0xff]  ;;  %v35_v9 = vld [vmem:[%s645_s2 + $0x10] sm:$0xff] }
   0x3   :  { %v451_v7 = vpack.c.bf16 %v24_v4, %v23_v2  ;;  %413 = vmatprep.mubr.msk.f32.mxu0 %vm81_vm0, %v25_v5  ;;  %v33_v8 = vld [vmem:[%s645_s2] sm:$0xff]  ;;  %53 = vperm.xlu1 %476, %v35_v9   ;;  %v34_v10 = vld [vmem:[%s645_s2 + $0x8] sm:$0xff]  ;;  %v36_v11 = vld [vmem:[%s645_s2 + $0x18] sm:$0xff] }
   0x4   :  { %448 = vmatprep.subr.bf16.mxu0 %v447_v3  ;;  %43 = vperm.xlu0 %475, %v33_v8   ;;  %v26_v12 = vld [vmem:[%s644_s1 + $0x8] sm:$0xff] }
   0x5   :  { %450 = vmatpush3.bf16.msra.mxu0 %v447_v3 }
   0x6   :  { %452 = vmatprep.subr.bf16.mxu0 %v451_v7 }
   0x9   :  { %454 = vmatpush3.bf16.msra.mxu0 %v451_v7 }
   0xa   :  { %10 = vsyncpa [#allocation3], 0  ;;  %v27_v13 = vld [vmem:[%s644_s1 + $0x10] sm:$0xff]  ;;  %48 = vperm.xlu0 %475, %v34_v10   ;;  %58 = vperm.xlu1 %476, %v36_v11   ;;  %v37_v14 = vld [vmem:[%s645_s2 + $0x20] sm:$0xff]  ;;  %vm247_vm1 = vcmask 523264   ;;  %s502_s19 = smov [#allocation2]  }
   0xb   :  { %v38_v15 = vld [vmem:[%s645_s2 + $0x28] sm:$0xff]  ;;  %v28_v16 = vld [vmem:[%s644_s1 + $0x18] sm:$0xff]  ;;  %v29_v17 = vld [vmem:[%s644_s1 + $0x20] sm:$0xff]  ;;  %s358_s20 = sshll.u32 %s502_s19, 4  ;;  %s359_s20 = int_to_ptr.vmem [resolvable:$true] %s358_s20 }
   0xc   :  { %414 = vmatmul.mubr.msk.f32.vlgmr.msra.gmra.mrb[0].mxu0 %vm81_vm0, %v26_v12  ;;  %v39_v18 = vld [vmem:[%s645_s2 + $0x30] sm:$0xff]  ;;  %v40_v19 = vld [vmem:[%s645_s2 + $0x38] sm:$0xff]  ;;  %v30_v20 = vld [vmem:[%s644_s1 + $0x28] sm:$0xff]  ;;  %p482_p1 = scmp.lt.s32.totalorder %s359_s20, %s359_s20 }
   0xd   :  { %416 = vmatprep.mubr.msk.f32.mxu0 %vm81_vm0, %v27_v13  ;;  %v31_v21 = vld [vmem:[%s644_s1 + $0x30] sm:$0xff]  ;;  %v223_v22 = vld [vmem:[%s647_s4] sm:$0xff]  ;;  %v224_v23 = vld [vmem:[%s647_s4 + $0x8] sm:$0xff] }
   0xe   :  { %63 = vperm.xlu0 %475, %v37_v14   ;;  %68 = vperm.xlu1 %476, %v38_v15   ;;  %v32_v24 = vld [vmem:[%s644_s1 + $0x38] sm:$0xff]  ;;  %v225_v25 = vld [vmem:[%s647_s4 + $0x10] sm:$0xff]  ;;  %v219_v27 = vld [vmem:[%s646_s3] sm:$0xff] }
   0xf   :  { %v226_v26 = vld [vmem:[%s647_s4 + $0x18] sm:$0xff]  ;;  %441 = vmatprep.mubr.msk.f32.mxu1 %vm247_vm1, %v219_v27  ;;  %v220_v0 = vld [vmem:[%s646_s3 + $0x8] sm:$0xff]  ;;  %v221_v1 = vld [vmem:[%s646_s3 + $0x10] sm:$0xff] }
  0x10   :  { %417 = vmatmul.mubr.msk.f32.gmra.mrb[2].mxu0 %vm81_vm0, %v28_v16  ;;  %v222_v2 = vld [vmem:[%s646_s3 + $0x18] sm:$0xff]  ;;  %s477_s3 = scalar_lea.vmem %s359_s20, 512 }
  0x11   :  { %419 = vmatprep.mubr.msk.f32.mxu0 %vm81_vm0, %v29_v17  ;;  %p478_p0 = scmp.ne.s32.totalorder %s359_s20, %s477_s3  ;;  %p483_p2 = scmp.lt.s32.totalorder %s477_s3, %s477_s3 }
  0x12   :  { %73 = vperm.xlu0 %475, %v39_v18   ;;  %78 = vperm.xlu1 %476, %v40_v19  }
  0x13   :  { %p484_p3 = por %p483_p2, %p482_p1 }
  0x14   :  { %420 = vmatmul.mubr.msk.f32.gmra.mrb[4].mxu0 %vm81_vm0, %v30_v20 }
  0x15   :  { %422 = vmatprep.mubr.msk.f32.mxu0 %vm81_vm0, %v31_v21  ;;  %p485_p4 = pnand %p484_p3, %p478_p0 }
  0x16   :  { %229 = vperm.xlu0 %475, %v223_v22   ;;  %234 = vperm.xlu1 %476, %v224_v23  }
  0x18   :  { %423 = vmatmul.mubr.msk.f32.gmra.mrb[6].mxu0 %vm81_vm0, %v32_v24 }
  0x1a   :  { %239 = vperm.xlu0 %475, %v225_v25   ;;  %244 = vperm.xlu1 %476, %v226_v26  }
  0x82   :  { %v54_v29 = vpop.permute.xlu1 %53 }
  0x83   :  { %v44_v28 = vpop.permute.xlu0 %43 }
  0x89   :  { %v49_v30 = vpop.permute.xlu0 %48  ;;  %v59_v31 = vpop.permute.xlu1 %58 }
  0x8d   :  { %v69_v41 = vpop.permute.xlu1 %68  ;;  %v64_v44 = vpop.permute.xlu0 %63 }
  0x91   :  { %v79_v53 = vpop.permute.xlu1 %78  ;;  %v74_v56 = vpop.permute.xlu0 %73 }
  0x95   :  { %v235_v3 = vpop.permute.xlu1 %234  ;;  %v230_v4 = vpop.permute.xlu0 %229 }
  0x99   :  { %v245_v10 = vpop.permute.xlu1 %244  ;;  %v240_v13 = vpop.permute.xlu0 %239 }
  0xdf   :  { %v415_v32 = vpop.f32.mrb[0].mxu0 }
  0xe0   :  { %v178_v33 = vadd.f32 %v415_v32, %v49_v30  ;;  %v172_v34 = vpop.f32.mrb[1].mxu0 }
  0xe1   :  { %v173_v35 = vadd.f32 %v172_v34, %v44_v28 }
  0xe2   :  { %v212_v36 = vmax.f32 %v178_v33, 0.0 }
  0xe3   :  { %v211_v37 = vmax.f32 %v173_v35, 0.0  ;;  %v418_v38 = vpop.f32.mrb[2].mxu0 }
  0xe4   :  { %v188_v39 = vadd.f32 %v418_v38, %v59_v31  ;;  %v182_v40 = vpop.f32.mrb[3].mxu0 }
  0xe5   :  { %v183_v42 = vadd.f32 %v182_v40, %v54_v29  ;;  %v455_v43 = vpack.c.bf16 %v212_v36, %v211_v37 }
  0xe6   :  { %v214_v45 = vmax.f32 %v188_v39, 0.0 }
  0xe7   :  { %v213_v46 = vmax.f32 %v183_v42, 0.0  ;;  %v421_v47 = vpop.f32.mrb[4].mxu0  ;;  %456 = vmatprep.subr.bf16.mxu1 %v455_v43 }
  0xe8   :  { %v198_v48 = vadd.f32 %v421_v47, %v69_v41  ;;  %v192_v49 = vpop.f32.mrb[5].mxu0  ;;  %458 = vmatpush3.bf16.msra.mxu1 %v455_v43 }
  0xe9   :  { %v459_v50 = vpack.c.bf16 %v214_v45, %v213_v46  ;;  %v193_v51 = vadd.f32 %v192_v49, %v64_v44 }
  0xea   :  { %v216_v52 = vmax.f32 %v198_v48, 0.0 }
  0xeb   :  { %v215_v54 = vmax.f32 %v193_v51, 0.0  ;;  %v424_v55 = vpop.f32.mrb[6].mxu0  ;;  %460 = vmatprep.subr.bf16.mxu1 %v459_v50 }
  0xec   :  { %v208_v57 = vadd.f32 %v424_v55, %v79_v53  ;;  %v202_v58 = vpop.f32.mrb[7].mxu0  ;;  %462 = vmatpush3.bf16.msra.mxu1 %v459_v50 }
  0xed   :  { %v463_v59 = vpack.c.bf16 %v216_v52, %v215_v54  ;;  %v203_v60 = vadd.f32 %v202_v58, %v74_v56 }
  0xee   :  { %v218_v61 = vmax.f32 %v208_v57, 0.0 }
  0xef   :  { %v217_v62 = vmax.f32 %v203_v60, 0.0  ;;  %464 = vmatprep.subr.bf16.mxu1 %v463_v59 }
  0xf0   :  { %466 = vmatpush3.bf16.msra.mxu1 %v463_v59 }
  0xf1   :  { %v467_v63 = vpack.c.bf16 %v218_v61, %v217_v62 }
  0xf3   :  { %468 = vmatprep.subr.bf16.mxu1 %v467_v63 }
  0xf4   :  { %470 = vmatpush3.bf16.msra.mxu1 %v467_v63 }
  0xf7   :  { %442 = vmatmul.mubr.msk.f32.vlgmr.msra.gmra.mrb[0].mxu1 %vm247_vm1, %v220_v0 }
  0xf8   :  { %444 = vmatprep.mubr.msk.f32.mxu1 %vm247_vm1, %v221_v1 }
  0xfb   :  { %445 = vmatmul.mubr.msk.f32.gmra.mrb[2].mxu1 %vm247_vm1, %v222_v2 }
 0x1ca   :  { %v443_v5 = vpop.f32.mrb[0].mxu1 }
 0x1cb   :  { %v332_v6 = vadd.f32 %v443_v5, %v235_v3  ;;  %v326_v7 = vpop.f32.mrb[1].mxu1 }
 0x1cc   :  { %v327_v8 = vadd.f32 %v326_v7, %v230_v4 }
 0x1cd   :  { %v346_v9 = vmax.f32 %v332_v6, 0.0 }
 0x1ce   :  { %v345_v11 = vmax.f32 %v327_v8, 0.0  ;;  %v446_v12 = vpop.f32.mrb[2].mxu1 }
 0x1cf   :  { %350 = vst [vmem:[#allocation2 + $0x8] sm:$0xff] %v346_v9  ;;  %v342_v14 = vadd.f32 %v446_v12, %v245_v10  ;;  %v336_v15 = vpop.f32.mrb[3].mxu1 }
 0x1d0   :  { %349 = vst [vmem:[#allocation2] sm:$0xff] %v345_v11  ;;  %v337_v16 = vadd.f32 %v336_v15, %v240_v13 }
 0x1d1   :  { %v348_v17 = vmax.f32 %v342_v14, 0.0 }
 0x1d2   :  { %v347_v18 = vmax.f32 %v337_v16, 0.0 }
 0x1d3   :  { %352 = vst [vmem:[#allocation2 + $0x18] sm:$0xff] %v348_v17 }
 0x1d4   :  { %351 = vst [vmem:[#allocation2 + $0x10] sm:$0xff] %v347_v18 }
 0x1d5   :  { %488 = shalt.err (!%p485_p4)
}
 0x1d6   :  { %s489_s23 = scalar_lea.hbm %s648_s5, 512 }
 0x1d7   :  { %p490_p5 = scmp.ne.s32.totalorder %s648_s5, %s489_s23  ;;  %p493_p6 = scmp.lt.u32.totalorder %s489_s23, %s648_s5 }
 0x1d9   :  { %p495_p7 = pnand %p493_p6, %p490_p5 }
 0x1db   :  { %498 = shalt.err (!%p495_p7)
}
 0x1dc   :  { %s503_s28 = smov 128   ;;  %s504_s29 = smov 8  }
 0x1dd   :  { %364 = dma.vmem_to_hbm [thread:$0]  %s359_s20, 512, %s648_s5, [#allocation3], %s503_s28, %s503_s28, %s504_s29  }
 0x1de   :  { %499 = dma.done.wait [#allocation3], 512  }
 0x1df   :  { %500 = vsyncadd [#allocation3], 4294966784 }
 0x1e0   :  { %368 = vsyncpa [#allocation3], 1 }

</bundles_post_ra>
